<compile_context>
chip_gen: v7x
topology: tpu7x:2x2x1
jax: 0.10.0
libtpu: 0.0.40
codegen_flags: <defaults>
</compile_context>

<pallas_src>
import numpy as np
import jax
import jax.numpy as jnp
from jax.experimental import pallas as pl
from jax.experimental.pallas import tpu as pltpu


def _round_up(x, m):
    return ((x + m - 1) // m) * m


def _constant_input_kernel(c_ref, o_ref):
    # c_ref block: (1, Kp)  -- flattened, lane-padded learned constant; same
    #                          block index every grid step -> VMEM resident.
    # o_ref block: (TB, Kp) -- TB batch rows of the output, lane-dense.
    o_ref[...] = jnp.broadcast_to(c_ref[...], o_ref.shape)


def constant_input_forward(const_param, latent, *, force_pallas=False):
    """Pallas implementation of ConstantInput.forward.

    const_param: (1, C, H, W) learned constant parameter.
    latent:      any array; only latent.shape[0] (batch) is used.
    returns:     (batch, C, H, W) = const_param repeated along batch.
    """
    batch = latent.shape[0]
    _, C, H, W = const_param.shape
    K = C * H * W
    itemsize = const_param.dtype.itemsize
    out_shape = (batch, C, H, W)

    if batch == 0:
        return jnp.zeros(out_shape, const_param.dtype)

    total_bytes = batch * K * itemsize
    if not force_pallas and total_bytes < (1 << 20):
        # Small output (the real StyleGAN constant layer is <= ~1 MiB): let
        # XLA fuse the broadcast into the consumer instead of forcing an HBM
        # materialisation through a kernel launch.
        return jnp.broadcast_to(const_param, out_shape)

    # ---- lane-dense layout -------------------------------------------------
    # Flatten to a single row of K elements; pad the lane axis to a multiple
    # of 128 so every in-kernel store is a full-width unmasked vst.
    Kp = _round_up(K, 128)
    const_flat = const_param.reshape(1, K)
    if Kp != K:
        const_flat = jnp.pad(const_flat, ((0, 0), (0, Kp - K)))

    # ---- batch tiling --------------------------------------------------------
    bytes_per_row = Kp * itemsize
    cap_bytes = 4 << 20  # 4 MiB block -> 8 MiB double-buffered: OK on v5e/v6e/v7x.
    TB = min(batch, max(1, cap_bytes // bytes_per_row))
    # Keep both v7x TensorCores busy when the whole batch would otherwise be a
    # single grid step.
    if TB >= batch and batch >= 16:
        TB = pl.cdiv(batch, 2)
    # Multiple-of-8 row blocks -> fully packed sublanes, unmasked stores.
    if TB >= 8:
        TB = (TB // 8) * 8
    TB = int(max(1, min(TB, batch)))
    grid = (pl.cdiv(batch, TB),)

    out_flat = pl.pallas_call(
        _constant_input_kernel,
        out_shape=jax.ShapeDtypeStruct((batch, Kp), const_param.dtype),
        grid=grid,
        # Same block index every step -> the constant stays VMEM-resident.
        in_specs=[pl.BlockSpec((1, Kp), lambda b: (0, 0))],
        # Lane-dense output blocks (full padded row on the lane axis).
        out_specs=pl.BlockSpec((TB, Kp), lambda b: (b, 0)),
        compiler_params=pltpu.CompilerParams(
            dimension_semantics=("parallel",)),
        cost_estimate=pl.CostEstimate(
            flops=0,
            transcendentals=0,
            bytes_accessed=(1 + batch) * Kp * itemsize),
    )(const_flat)

    if Kp != K:
        out_flat = out_flat[:, :K]   # drop lane padding (only for K % 128 != 0)
    return out_flat.reshape(out_shape)


def _reference(const_param, latent):
    """Pure-JAX reference: torch `repeat(batch, 1, 1, 1)` == broadcast."""
    batch = latent.shape[0]
    return jnp.broadcast_to(const_param, (batch,) + const_param.shape[1:])


if __name__ == "__main__":
    key = jax.random.PRNGKey(0)
    k_param, k_latent, k_param2, k_latent2 = jax.random.split(key, 4)

    # Small shapes consistent with the module defaults (channel=4, size=4);
    # the latent `input` is only consulted for its batch dimension.
    channel, size, batch, style_dim = 4, 4, 2, 32
    const_param = jax.random.normal(k_param, (1, channel, size, size),
                                    dtype=jnp.float32)
    latent = jax.random.normal(k_latent, (batch, style_dim), dtype=jnp.float32)

    # Force the Pallas path so the kernel itself is exercised (K=64 -> padded
    # to 128 lanes; whole batch in one grid step).
    out = constant_input_forward(const_param, latent, force_pallas=True)
    out = jax.block_until_ready(out)
    np.testing.assert_allclose(np.asarray(out),
                               np.asarray(_reference(const_param, latent)),
                               rtol=0, atol=0)
    assert out.shape == (batch, channel, size, size)

    # Default path for the same small shapes: bypasses Pallas (fusable broadcast).
    out_default = jax.block_until_ready(constant_input_forward(const_param, latent))
    np.testing.assert_allclose(np.asarray(out_default), np.asarray(out),
                               rtol=0, atol=0)

    # Realistic StyleGAN constant-layer shapes (C=512, size=4, batch=16):
    # lane-dense K = 8192 (no padding), TB = 8 (multiple of 8), 2-step grid.
    channel2, batch2 = 512, 16
    const_param2 = jax.random.normal(k_param2, (1, channel2, size, size),
                                     dtype=jnp.float32)
    latent2 = jax.random.normal(k_latent2, (batch2, style_dim), dtype=jnp.float32)
    out2 = jax.block_until_ready(
        constant_input_forward(const_param2, latent2, force_pallas=True))
    np.testing.assert_allclose(np.asarray(out2),
                               np.asarray(_reference(const_param2, latent2)),
                               rtol=0, atol=0)
    assert out2.shape == (batch2, channel2, size, size)

    print("KERNEL_OK")
</pallas_src>

<mosaic_0001>
module attributes {stable_mosaic.version = 11 : i64} {
  func.func @_constant_input_kernel(%arg0: i32, %arg1: memref<1x128xf32, #tpu.memory_space<vmem>>, %arg2: memref<2x128xf32, #tpu.memory_space<vmem>>) attributes {dimension_semantics = [#tpu.dimension_semantics<parallel>], iteration_bounds = array<i64: 1>, scalar_prefetch = 0 : i64, scratch_operands = 0 : i64, tpu.core_type = #tpu.core_type<tc>, window_params = [{pipeline_mode = #tpu.pipeline_mode<synchronous>, transform_indices = @transform_0, window_bounds = array<i64: 1, 128>}, {transform_indices = @transform_1, window_bounds = array<i64: 2, 128>}]} {
    %c0 = arith.constant 0 : index
    %c0_0 = arith.constant 0 : index
    %0 = vector.load %arg1[%c0, %c0_0] : memref<1x128xf32, #tpu.memory_space<vmem>>, vector<1x128xf32>
    %1 = vector.shape_cast %0 : vector<1x128xf32> to vector<1x128xf32>
    %2 = vector.broadcast %1 : vector<1x128xf32> to vector<2x128xf32>
    %c0_1 = arith.constant 0 : index
    %c0_2 = arith.constant 0 : index
    %3 = vector.load %arg2[%c0_1, %c0_2] : memref<2x128xf32, #tpu.memory_space<vmem>>, vector<2x128xf32>
    tpu.vector_store %arg2[%c0_1, %c0_2], %2 {strides = array<i32>} : memref<2x128xf32, #tpu.memory_space<vmem>>, vector<2x128xf32>,
    return
  }
  func.func @transform_0(%arg0: i32) -> (i32, i32) {
    %c0_i32 = arith.constant 0 : i32
    %c0_i32_0 = arith.constant 0 : i32
    %c0_i32_1 = arith.constant 0 : i32
    return %c0_i32, %c0_i32_0 : i32, i32
  }
  func.func @transform_1(%arg0: i32) -> (i32, i32) {
    %c0_i32 = arith.constant 0 : i32
    %c0_i32_0 = arith.constant 0 : i32
    return %arg0, %c0_i32 : i32, i32
  }
}

</mosaic_0001>

<bundles_post_ra>
// kernel: tpu_custom_call.1
= control target key start
LH: loop header
LB: loop body
LE: loop exit
PB: predicated region body
PF: predicated region fallthrough
CT: control target
= control target key end

     0   :  { %6 = vsyncpa [#allocation3], 0  ;;  %s131_s0 = inlined_call_operand.hbm [shape: f32[1,128], index: 0, kind: input, shape index: {}]   ;;  %s132_s1 = inlined_call_operand.hbm [shape: f32[2,128], index: 1, kind: output, shape index: {}]  }
   0x1   :  { %7 = vsyncpa [#allocation4], 0  ;;  %s95_s6 = smov [#allocation2]   ;;  %s47_s10 = scalar_lea.hbm %s131_s0, 16 }
   0x2   :  { %s14_s7 = sshll.u32 %s95_s6, 4  ;;  %p48_p0 = scmp.ne.s32.totalorder %s131_s0, %s47_s10  ;;  %s15_s7 = int_to_ptr.vmem [resolvable:$true] %s14_s7 }
   0x3   :  { %p51_p1 = scmp.lt.u32.totalorder %s47_s10, %s131_s0 }
   0x5   :  { %p53_p2 = pnand %p51_p1, %p48_p0 }
   0x7   :  { %56 = shalt.err (!%p53_p2)
}
   0x8   :  { %s57_s15 = scalar_lea.vmem %s15_s7, 16  ;;  %s61_s16 = scalar_lea.vmem %s15_s7, 32 }
   0x9   :  { %p58_p3 = scmp.ne.s32.totalorder %s15_s7, %s57_s15  ;;  %p62_p4 = scmp.lt.s32.totalorder %s15_s7, %s15_s7 }
   0xa   :  { %p63_p5 = scmp.lt.s32.totalorder %s61_s16, %s57_s15 }
   0xc   :  { %p64_p6 = por %p63_p5, %p62_p4 }
   0xe   :  { %p65_p7 = pnand %p64_p6, %p58_p3 }
  0x10   :  { %68 = shalt.err (!%p65_p7)
}
  0x11   :  { %17 = dma.hbm_to_vmem [thread:$0]  %s131_s0, 16, %s15_s7, [#allocation3]  }
  0x12   :  { %91 = dma.done.wait [#allocation3], 16  }
  0x13   :  { %92 = vsyncadd [#allocation3], 4294967280  ;;  %s96_s19 = smov [#allocation5]   ;;  %v44_v0 = vld [vmem:[#allocation2] ss:$0 sm:$0xff] }
  0x14   :  { %s35_s20 = sshll.u32 %s96_s19, 4  ;;  %28 = vst [vmem:[#allocation5] sm:$0x3] %v44_v0  ;;  %s36_s20 = int_to_ptr.vmem [resolvable:$true] %s35_s20 }
  0x15   :  { %s69_s21 = scalar_lea.vmem %s36_s20, 32  ;;  %p74_p9 = scmp.lt.s32.totalorder %s36_s20, %s36_s20 }
  0x16   :  { %p70_p8 = scmp.ne.s32.totalorder %s36_s20, %s69_s21  ;;  %p75_p10 = scmp.lt.s32.totalorder %s69_s21, %s69_s21 }
  0x18   :  { %p76_p11 = por %p75_p10, %p74_p9 }
  0x1a   :  { %p77_p12 = pnand %p76_p11, %p70_p8 }
  0x1c   :  { %80 = shalt.err (!%p77_p12)
}
  0x1d   :  { %s81_s24 = scalar_lea.hbm %s132_s1, 32 }
  0x1e   :  { %p82_p13 = scmp.ne.s32.totalorder %s132_s1, %s81_s24  ;;  %p85_p0 = scmp.lt.u32.totalorder %s81_s24, %s132_s1 }
  0x20   :  { %p87_p1 = pnand %p85_p0, %p82_p13 }
  0x22   :  { %90 = shalt.err (!%p87_p1)
}
  0x23   :  { %38 = dma.vmem_to_hbm [thread:$0]  %s36_s20, 32, %s132_s1, [#allocation4]  }
  0x24   :  { %93 = dma.done.wait [#allocation4], 32  }
  0x25   :  { %94 = vsyncadd [#allocation4], 4294967264 }
  0x26   :  { %42 = vsyncpa [#allocation3], 1 }
  0x27   :  { %43 = vsyncpa [#allocation4], 1 }

</bundles_post_ra>
